<compile_context>
chip_gen: v7x
topology: tpu7x:2x2x1
jax: 0.10.0
libtpu: 0.0.40
codegen_flags: <defaults>
</compile_context>

<pallas_src>
import math

import jax
import jax.numpy as jnp
from jax.experimental import pallas as pl
from jax.experimental.pallas import tpu as pltpu


def _softsign(v):
    # torch.nn.Softsign: x / (1 + |x|)
    return v / (1.0 + jnp.abs(v))


def _round_up(a, b):
    return ((a + b - 1) // b) * b


def _cdiv(a, b):
    return -(-a // b)


def _make_fused_kernel(num_layers, hidden_size, mm_dtype):
    L, H = num_layers, hidden_size

    def kernel(*refs):
        # inputs: x, hc, then per-layer (w_fused, bias, w_og), then lin_w, lin_b
        x_ref, hc_ref = refs[0], refs[1]
        cell_refs = refs[2:2 + 3 * L]
        lin_w_ref = refs[2 + 3 * L]
        lin_b_ref = refs[3 + 3 * L]
        # outputs: linear output (TM, 2), packed h/c slab (TM, 2*L*H)
        out_ref = refs[4 + 3 * L]
        hc_out_ref = refs[5 + 3 * L]

        temp = x_ref[...]                       # (TM, In_p) current layer input
        hc = hc_ref[...]                        # (TM, 2*L*H) packed [h0|c0|h1|c1|...]
        hc_new_parts = []
        for layer in range(L):                  # unrolled: static slices/refs only
            w_ref, b_ref, wog_ref = cell_refs[3 * layer: 3 * layer + 3]
            hc_l = hc[:, 2 * H * layer: 2 * H * (layer + 1)]   # [h_l | c_l]
            c_l = hc_l[:, H:2 * H]

            # single fused 4-gate projection over K = [temp | h_l | c_l]
            kin = jnp.concatenate([temp, hc_l], axis=-1)        # (TM, K)
            wb = (jnp.dot(kin.astype(mm_dtype), w_ref[...],
                          preferred_element_type=jnp.float32)
                  + b_ref[...])                                 # (TM, 4H)

            forget_gate = jax.nn.sigmoid(wb[:, 0:H])
            input_gate = jax.nn.sigmoid(wb[:, H:2 * H])
            c_new = forget_gate * c_l + input_gate * _softsign(wb[:, 2 * H:3 * H])
            output_gate = jax.nn.sigmoid(
                wb[:, 3 * H:4 * H]
                + jnp.dot(c_new.astype(mm_dtype), wog_ref[...],
                          preferred_element_type=jnp.float32))
            h_new = output_gate * _softsign(c_new)

            hc_new_parts.append(h_new)
            hc_new_parts.append(c_new)
            temp = h_new

        # lane-dense packed state writeback + Linear epilogue on the same slab
        hc_new = jnp.concatenate(hc_new_parts, axis=-1)         # (TM, 2*L*H)
        hc_out_ref[...] = hc_new
        out_ref[...] = (jnp.dot(hc_new.astype(mm_dtype), lin_w_ref[...],
                                preferred_element_type=jnp.float32)
                        + lin_b_ref[...])

    return kernel


def init_params(key, input_size, hidden_size, num_layers):
    """Deterministic init mirroring TraceLSTMCell.reset_parameters (uniform +-1/sqrt(H)).

    Full 6H / 3H weight shapes are kept (matching the PyTorch parameters); dead
    gate columns are pruned only in the wrapper.  (w_ee, w_rr, b_k are dead
    parameters in the PyTorch forward and are skipped.)"""
    params = {'cells': []}
    stdv = 1.0 / math.sqrt(hidden_size)
    for layer in range(num_layers):
        in_sz = input_size if layer == 0 else hidden_size
        key, k0, k1, k2, k3, k4 = jax.random.split(key, 6)
        cell = {
            'w_ii': jax.random.uniform(k0, (in_sz, 6 * hidden_size),
                                       jnp.float32, -stdv, stdv),
            'w_hh': jax.random.uniform(k1, (hidden_size, 6 * hidden_size),
                                       jnp.float32, -stdv, stdv),
            'w_cc': jax.random.uniform(k2, (hidden_size, 3 * hidden_size),
                                       jnp.float32, -stdv, stdv),
            # bias = bias_ih + bias_hh, precombined exactly as in the forward pass
            'bias': (jax.random.uniform(k3, (1, 6 * hidden_size),
                                        jnp.float32, -stdv, stdv)
                     + jax.random.uniform(k4, (1, 6 * hidden_size),
                                          jnp.float32, -stdv, stdv)),
        }
        params['cells'].append(cell)
    key, kw, kb = jax.random.split(key, 3)
    lin_stdv = 1.0 / math.sqrt(hidden_size * num_layers)
    params['linear_w'] = jax.random.uniform(
        kw, (hidden_size * num_layers, 2), jnp.float32, -lin_stdv, lin_stdv)
    params['linear_b'] = jax.random.uniform(
        kb, (1, 2), jnp.float32, -lin_stdv, lin_stdv)
    return params


def _prep_weights(params, input_size, hidden_size, in_pad, mm_dtype):
    """Prune dead gate columns, stack per-layer weights into a single (K, 4H)
    fused projection, and row-expand the Linear to the packed [h|c] layout."""
    H = hidden_size
    L = len(params['cells'])
    cell_ws = []
    for layer, cell in enumerate(params['cells']):
        w_ii, w_hh, w_cc = cell['w_ii'], cell['w_hh'], cell['w_cc']
        w_x = jnp.concatenate([w_ii[:, :3 * H], w_ii[:, 4 * H:5 * H]], axis=1)
        if layer == 0 and in_pad:                         # zero rows for x lane pad
            w_x = jnp.pad(w_x, ((0, in_pad), (0, 0)))
        w_h = jnp.concatenate([w_hh[:, :3 * H], w_hh[:, 4 * H:5 * H]], axis=1)
        w_c = jnp.concatenate([w_cc[:, :2 * H],
                               jnp.zeros((H, 2 * H), jnp.float32)], axis=1)
        w_fused = jnp.concatenate([w_x, w_h, w_c], axis=0).astype(mm_dtype)  # (K,4H)
        bias = jnp.concatenate([cell['bias'][:, :3 * H],
                                cell['bias'][:, 4 * H:5 * H]], axis=1)       # (1,4H)
        w_og = w_cc[:, 2 * H:3 * H].astype(mm_dtype)                         # (H, H)
        cell_ws.extend([w_fused, bias, w_og])

    # Linear weight rows rearranged to packed [h0|c0|h1|c1|...] order (zero c rows)
    lw = params['linear_w']                               # (L*H, 2)
    lw_packed = jnp.zeros((2 * L * H, lw.shape[1]), jnp.float32)
    for layer in range(L):
        lw_packed = lw_packed.at[2 * H * layer: 2 * H * layer + H].set(
            lw[H * layer: H * (layer + 1)])
    return cell_ws, lw_packed.astype(mm_dtype), params['linear_b']


def trace_lstm_forward(params, x, h, c, *, tile_m=1024, matmul_dtype=jnp.float32):
    N, B, In = x.shape
    L, H = h.shape[1], h.shape[-1]
    M = N * B
    OUT = params['linear_w'].shape[1]
    In_p = _round_up(In, 32)                  # lane-pad x so in-kernel concats are 32-aligned

    # --- balanced M-tiling: big tiles, >=2 tiles for v7x megacore, minimal tail pad ---
    n_tiles = max(1, _cdiv(M, tile_m))
    if M >= 256:
        n_tiles = max(n_tiles, 2)             # keep both v7x TensorCores busy
    TM = _round_up(_cdiv(M, n_tiles), 8)
    Mp = n_tiles * TM

    # flatten (N, B) -> M rows; pack h/c lane-dense as [h0|c0|h1|c1|...]
    x2 = x.reshape(M, In)
    if In_p != In:
        x2 = jnp.pad(x2, ((0, 0), (0, In_p - In)))
    h2 = jnp.transpose(h, (0, 2, 1, 3)).reshape(M, L, 1, H)
    c2 = jnp.transpose(c, (0, 2, 1, 3)).reshape(M, L, 1, H)
    hc2 = jnp.concatenate([h2, c2], axis=2).reshape(M, 2 * L * H)
    if Mp != M:
        x2 = jnp.pad(x2, ((0, Mp - M), (0, 0)))
        hc2 = jnp.pad(hc2, ((0, Mp - M), (0, 0)))

    cell_ws, lin_w, lin_b = _prep_weights(params, In, H, In_p - In, matmul_dtype)

    const_map = lambda m: (0, 0)
    in_specs = [
        pl.BlockSpec((TM, In_p), lambda m: (m, 0)),          # x tile
        pl.BlockSpec((TM, 2 * L * H), lambda m: (m, 0)),     # packed h/c tile
    ]
    for w in cell_ws:                                        # weights: VMEM-resident
        in_specs.append(pl.BlockSpec(w.shape, const_map))
    in_specs.append(pl.BlockSpec(lin_w.shape, const_map))
    in_specs.append(pl.BlockSpec(lin_b.shape, const_map))

    out_specs = (
        pl.BlockSpec((TM, OUT), lambda m: (m, 0)),           # linear output (no pad)
        pl.BlockSpec((TM, 2 * L * H), lambda m: (m, 0)),     # packed h/c output
    )
    out_shape = (
        jax.ShapeDtypeStruct((Mp, OUT), jnp.float32),
        jax.ShapeDtypeStruct((Mp, 2 * L * H), jnp.float32),
    )

    out_p, hc_out = pl.pallas_call(
        _make_fused_kernel(L, H, matmul_dtype),
        out_shape=out_shape,
        grid=(n_tiles,),
        in_specs=in_specs,
        out_specs=out_specs,
        compiler_params=pltpu.CompilerParams(
            dimension_semantics=("parallel",),               # M tiles shard across TCs
            vmem_limit_bytes=32 * 1024 * 1024),
    )(x2, hc2, *cell_ws, lin_w, lin_b)

    output = out_p[:M].reshape(N, B, OUT)
    hc4 = hc_out[:M].reshape(N, B, L, 2, H)
    out_hn = jnp.transpose(hc4[:, :, :, 0, :], (0, 2, 1, 3))   # (N, L, B, H)
    out_cn = jnp.transpose(hc4[:, :, :, 1, :], (0, 2, 1, 3))
    return output, out_hn, out_cn


# -------- pure-JAX reference (full 6H weights, same math, no Pallas) --------
def _ref_forward(params, x, h, c):
    N, B, _ = x.shape
    L, H = h.shape[1], h.shape[-1]
    temp = x
    out_hs, out_cs = [], []
    for layer in range(L):
        p = params['cells'][layer]
        hn, cn = h[:, layer], c[:, layer]
        wb = temp @ p['w_ii'] + hn @ p['w_hh'] + p['bias'][0]
        wc = p['w_cc']
        fg = jax.nn.sigmoid(wb[..., 0:H] + cn @ wc[:, 0:H])
        ig = jax.nn.sigmoid(wb[..., H:2 * H] + cn @ wc[:, H:2 * H])
        cn = fg * cn + ig * _softsign(wb[..., 2 * H:3 * H])
        og = jax.nn.sigmoid(wb[..., 4 * H:5 * H] + cn @ wc[:, 2 * H:3 * H])
        hn = og * _softsign(cn)
        temp = hn
        out_hs.append(hn)
        out_cs.append(cn)
    out_hn = jnp.stack(out_hs, axis=1)
    out_cn = jnp.stack(out_cs, axis=1)
    hn_perm = jnp.transpose(out_hn, (0, 2, 1, 3)).reshape(N, B, L * H)
    out = hn_perm @ params['linear_w'] + params['linear_b'][0]
    return out, out_hn, out_cn


if __name__ == "__main__":
    input_size, hidden_size, num_layers = 16, 32, 2
    N, B = 2, 4   # x: (N, B, input_size);  h, c: (N, num_layers, B, hidden_size)

    key = jax.random.PRNGKey(0)
    kp, kx, kh, kc = jax.random.split(key, 4)
    params = init_params(kp, input_size, hidden_size, num_layers)
    x = jax.random.normal(kx, (N, B, input_size), jnp.float32)
    h = jax.random.normal(kh, (N, num_layers, B, hidden_size), jnp.float32)
    c = jax.random.normal(kc, (N, num_layers, B, hidden_size), jnp.float32)

    ref_out, ref_hn, ref_cn = _ref_forward(params, x, h, c)

    # f32 matmul path (default, v5e-safe, tight parity with the PyTorch math)
    out, out_hn, out_cn = jax.block_until_ready(
        jax.jit(trace_lstm_forward)(params, x, h, c))
    assert out.shape == (N, B, 2)
    assert out_hn.shape == (N, num_layers, B, hidden_size)
    assert out_cn.shape == (N, num_layers, B, hidden_size)
    assert jnp.allclose(out, ref_out, atol=1e-5, rtol=1e-5)
    assert jnp.allclose(out_hn, ref_hn, atol=1e-5, rtol=1e-5)
    assert jnp.allclose(out_cn, ref_cn, atol=1e-5, rtol=1e-5)

    # bf16 matmul-operand path (v6e/v7x MXU-native; f32 accumulation + gate math)
    bf16_fwd = jax.jit(lambda p, a, hh, cc: trace_lstm_forward(
        p, a, hh, cc, matmul_dtype=jnp.bfloat16))
    out_b, hn_b, cn_b = jax.block_until_ready(bf16_fwd(params, x, h, c))
    assert jnp.allclose(out_b, ref_out, atol=5e-2, rtol=5e-2)
    assert jnp.allclose(hn_b, ref_hn, atol=5e-2, rtol=5e-2)
    assert jnp.allclose(cn_b, ref_cn, atol=5e-2, rtol=5e-2)

    print("KERNEL_OK")
</pallas_src>

<mosaic_0001>
module attributes {stable_mosaic.version = 11 : i64} {
  func.func @kernel(%arg0: i32, %arg1: memref<8x32xf32, #tpu.memory_space<vmem>>, %arg2: memref<8x128xf32, #tpu.memory_space<vmem>>, %arg3: memref<96x128xf32, #tpu.memory_space<vmem>>, %arg4: memref<1x128xf32, #tpu.memory_space<vmem>>, %arg5: memref<32x32xf32, #tpu.memory_space<vmem>>, %arg6: memref<96x128xf32, #tpu.memory_space<vmem>>, %arg7: memref<1x128xf32, #tpu.memory_space<vmem>>, %arg8: memref<32x32xf32, #tpu.memory_space<vmem>>, %arg9: memref<128x2xf32, #tpu.memory_space<vmem>>, %arg10: memref<1x2xf32, #tpu.memory_space<vmem>>, %arg11: memref<8x2xf32, #tpu.memory_space<vmem>>, %arg12: memref<8x128xf32, #tpu.memory_space<vmem>>) attributes {dimension_semantics = [#tpu.dimension_semantics<parallel>], iteration_bounds = array<i64: 1>, scalar_prefetch = 0 : i64, scratch_operands = 0 : i64, tpu.core_type = #tpu.core_type<tc>, window_params = [{transform_indices = @transform_0, window_bounds = array<i64: 8, 32>}, {transform_indices = @transform_1, window_bounds = array<i64: 8, 128>}, {pipeline_mode = #tpu.pipeline_mode<synchronous>, transform_indices = @transform_2, window_bounds = array<i64: 96, 128>}, {pipeline_mode = #tpu.pipeline_mode<synchronous>, transform_indices = @transform_3, window_bounds = array<i64: 1, 128>}, {pipeline_mode = #tpu.pipeline_mode<synchronous>, transform_indices = @transform_4, window_bounds = array<i64: 32, 32>}, {pipeline_mode = #tpu.pipeline_mode<synchronous>, transform_indices = @transform_5, window_bounds = array<i64: 96, 128>}, {pipeline_mode = #tpu.pipeline_mode<synchronous>, transform_indices = @transform_6, window_bounds = array<i64: 1, 128>}, {pipeline_mode = #tpu.pipeline_mode<synchronous>, transform_indices = @transform_7, window_bounds = array<i64: 32, 32>}, {pipeline_mode = #tpu.pipeline_mode<synchronous>, transform_indices = @transform_8, window_bounds = array<i64: 128, 2>}, {pipeline_mode = #tpu.pipeline_mode<synchronous>, transform_indices = @transform_9, window_bounds = array<i64: 1, 2>}, {transform_indices = @transform_10, window_bounds = array<i64: 8, 2>}, {transform_indices = @transform_11, window_bounds = array<i64: 8, 128>}]} {
    %c0 = arith.constant 0 : index
    %c0_0 = arith.constant 0 : index
    %0 = vector.load %arg1[%c0, %c0_0] : memref<8x32xf32, #tpu.memory_space<vmem>>, vector<8x32xf32>
    %c0_1 = arith.constant 0 : index
    %c0_2 = arith.constant 0 : index
    %1 = vector.load %arg2[%c0_1, %c0_2] : memref<8x128xf32, #tpu.memory_space<vmem>>, vector<8x128xf32>
    %2 = vector.extract_strided_slice %1 {offsets = [0, 0], sizes = [8, 64], strides = [1, 1]} : vector<8x128xf32> to vector<8x64xf32>
    %3 = vector.extract_strided_slice %2 {offsets = [0, 32], sizes = [8, 32], strides = [1, 1]} : vector<8x64xf32> to vector<8x32xf32>
    %4 = tpu.concatenate %0, %2 in 1 : vector<8x32xf32>, vector<8x64xf32> -> vector<8x96xf32>
    %c0_3 = arith.constant 0 : index
    %c0_4 = arith.constant 0 : index
    %5 = vector.load %arg3[%c0_3, %c0_4] : memref<96x128xf32, #tpu.memory_space<vmem>>, vector<96x128xf32>
    %cst = arith.constant dense<0.000000e+00> : vector<8x128xf32>
    %6 = tpu.matmul %4, %5, %cst {dimension_numbers = #tpu.dot_dimension_numbers<[1], [0], [0], [1], [0, 0, 1, 1], [], []>} : vector<8x96xf32>, vector<96x128xf32>, vector<8x128xf32> -> vector<8x128xf32>
    %c0_5 = arith.constant 0 : index
    %c0_6 = arith.constant 0 : index
    %7 = vector.load %arg4[%c0_5, %c0_6] : memref<1x128xf32, #tpu.memory_space<vmem>>, vector<1x128xf32>
    %8 = vector.broadcast %7 : vector<1x128xf32> to vector<8x128xf32>
    %9 = arith.addf %6, %8 : vector<8x128xf32>
    %10 = vector.extract_strided_slice %9 {offsets = [0, 0], sizes = [8, 32], strides = [1, 1]} : vector<8x128xf32> to vector<8x32xf32>
    %11 = arith.negf %10 : vector<8x32xf32>
    %12 = math.exp %11 : vector<8x32xf32>
    %cst_7 = arith.constant 1.000000e+00 : f32
    %13 = vector.broadcast %cst_7 : f32 to vector<8x32xf32>
    %14 = arith.addf %13, %12 : vector<8x32xf32>
    %15 = arith.divf %13, %14 : vector<8x32xf32>
    %16 = vector.extract_strided_slice %9 {offsets = [0, 32], sizes = [8, 32], strides = [1, 1]} : vector<8x128xf32> to vector<8x32xf32>
    %17 = arith.negf %16 : vector<8x32xf32>
    %18 = math.exp %17 : vector<8x32xf32>
    %cst_8 = arith.constant 1.000000e+00 : f32
    %19 = vector.broadcast %cst_8 : f32 to vector<8x32xf32>
    %20 = arith.addf %19, %18 : vector<8x32xf32>
    %21 = arith.divf %19, %20 : vector<8x32xf32>
    %22 = arith.mulf %15, %3 : vector<8x32xf32>
    %23 = vector.extract_strided_slice %9 {offsets = [0, 64], sizes = [8, 32], strides = [1, 1]} : vector<8x128xf32> to vector<8x32xf32>
    %24 = math.absf %23 : vector<8x32xf32>
    %cst_9 = arith.constant 1.000000e+00 : f32
    %25 = vector.broadcast %cst_9 : f32 to vector<8x32xf32>
    %26 = arith.addf %25, %24 : vector<8x32xf32>
    %27 = arith.divf %23, %26 : vector<8x32xf32>
    %28 = arith.mulf %21, %27 : vector<8x32xf32>
    %29 = arith.addf %22, %28 : vector<8x32xf32>
    %30 = vector.extract_strided_slice %9 {offsets = [0, 96], sizes = [8, 32], strides = [1, 1]} : vector<8x128xf32> to vector<8x32xf32>
    %c0_10 = arith.constant 0 : index
    %c0_11 = arith.constant 0 : index
    %31 = vector.load %arg5[%c0_10, %c0_11] : memref<32x32xf32, #tpu.memory_space<vmem>>, vector<32x32xf32>
    %cst_12 = arith.constant dense<0.000000e+00> : vector<8x32xf32>
    %32 = tpu.matmul %29, %31, %cst_12 {dimension_numbers = #tpu.dot_dimension_numbers<[1], [0], [0], [1], [0, 0, 1, 1], [], []>} : vector<8x32xf32>, vector<32x32xf32>, vector<8x32xf32> -> vector<8x32xf32>
    %33 = arith.addf %30, %32 : vector<8x32xf32>
    %34 = arith.negf %33 : vector<8x32xf32>
    %35 = math.exp %34 : vector<8x32xf32>
    %cst_13 = arith.constant 1.000000e+00 : f32
    %36 = vector.broadcast %cst_13 : f32 to vector<8x32xf32>
    %37 = arith.addf %36, %35 : vector<8x32xf32>
    %38 = arith.divf %36, %37 : vector<8x32xf32>
    %39 = math.absf %29 : vector<8x32xf32>
    %cst_14 = arith.constant 1.000000e+00 : f32
    %40 = vector.broadcast %cst_14 : f32 to vector<8x32xf32>
    %41 = arith.addf %40, %39 : vector<8x32xf32>
    %42 = arith.divf %29, %41 : vector<8x32xf32>
    %43 = arith.mulf %38, %42 : vector<8x32xf32>
    %44 = vector.extract_strided_slice %1 {offsets = [0, 64], sizes = [8, 64], strides = [1, 1]} : vector<8x128xf32> to vector<8x64xf32>
    %45 = vector.extract_strided_slice %44 {offsets = [0, 32], sizes = [8, 32], strides = [1, 1]} : vector<8x64xf32> to vector<8x32xf32>
    %46 = tpu.concatenate %43, %44 in 1 : vector<8x32xf32>, vector<8x64xf32> -> vector<8x96xf32>
    %c0_15 = arith.constant 0 : index
    %c0_16 = arith.constant 0 : index
    %47 = vector.load %arg6[%c0_15, %c0_16] : memref<96x128xf32, #tpu.memory_space<vmem>>, vector<96x128xf32>
    %cst_17 = arith.constant dense<0.000000e+00> : vector<8x128xf32>
    %48 = tpu.matmul %46, %47, %cst_17 {dimension_numbers = #tpu.dot_dimension_numbers<[1], [0], [0], [1], [0, 0, 1, 1], [], []>} : vector<8x96xf32>, vector<96x128xf32>, vector<8x128xf32> -> vector<8x128xf32>
    %c0_18 = arith.constant 0 : index
    %c0_19 = arith.constant 0 : index
    %49 = vector.load %arg7[%c0_18, %c0_19] : memref<1x128xf32, #tpu.memory_space<vmem>>, vector<1x128xf32>
    %50 = vector.broadcast %49 : vector<1x128xf32> to vector<8x128xf32>
    %51 = arith.addf %48, %50 : vector<8x128xf32>
    %52 = vector.extract_strided_slice %51 {offsets = [0, 0], sizes = [8, 32], strides = [1, 1]} : vector<8x128xf32> to vector<8x32xf32>
    %53 = arith.negf %52 : vector<8x32xf32>
    %54 = math.exp %53 : vector<8x32xf32>
    %cst_20 = arith.constant 1.000000e+00 : f32
    %55 = vector.broadcast %cst_20 : f32 to vector<8x32xf32>
    %56 = arith.addf %55, %54 : vector<8x32xf32>
    %57 = arith.divf %55, %56 : vector<8x32xf32>
    %58 = vector.extract_strided_slice %51 {offsets = [0, 32], sizes = [8, 32], strides = [1, 1]} : vector<8x128xf32> to vector<8x32xf32>
    %59 = arith.negf %58 : vector<8x32xf32>
    %60 = math.exp %59 : vector<8x32xf32>
    %cst_21 = arith.constant 1.000000e+00 : f32
    %61 = vector.broadcast %cst_21 : f32 to vector<8x32xf32>
    %62 = arith.addf %61, %60 : vector<8x32xf32>
    %63 = arith.divf %61, %62 : vector<8x32xf32>
    %64 = arith.mulf %57, %45 : vector<8x32xf32>
    %65 = vector.extract_strided_slice %51 {offsets = [0, 64], sizes = [8, 32], strides = [1, 1]} : vector<8x128xf32> to vector<8x32xf32>
    %66 = math.absf %65 : vector<8x32xf32>
    %cst_22 = arith.constant 1.000000e+00 : f32
    %67 = vector.broadcast %cst_22 : f32 to vector<8x32xf32>
    %68 = arith.addf %67, %66 : vector<8x32xf32>
    %69 = arith.divf %65, %68 : vector<8x32xf32>
    %70 = arith.mulf %63, %69 : vector<8x32xf32>
    %71 = arith.addf %64, %70 : vector<8x32xf32>
    %72 = vector.extract_strided_slice %51 {offsets = [0, 96], sizes = [8, 32], strides = [1, 1]} : vector<8x128xf32> to vector<8x32xf32>
    %c0_23 = arith.constant 0 : index
    %c0_24 = arith.constant 0 : index
    %73 = vector.load %arg8[%c0_23, %c0_24] : memref<32x32xf32, #tpu.memory_space<vmem>>, vector<32x32xf32>
    %cst_25 = arith.constant dense<0.000000e+00> : vector<8x32xf32>
    %74 = tpu.matmul %71, %73, %cst_25 {dimension_numbers = #tpu.dot_dimension_numbers<[1], [0], [0], [1], [0, 0, 1, 1], [], []>} : vector<8x32xf32>, vector<32x32xf32>, vector<8x32xf32> -> vector<8x32xf32>
    %75 = arith.addf %72, %74 : vector<8x32xf32>
    %76 = arith.negf %75 : vector<8x32xf32>
    %77 = math.exp %76 : vector<8x32xf32>
    %cst_26 = arith.constant 1.000000e+00 : f32
    %78 = vector.broadcast %cst_26 : f32 to vector<8x32xf32>
    %79 = arith.addf %78, %77 : vector<8x32xf32>
    %80 = arith.divf %78, %79 : vector<8x32xf32>
    %81 = math.absf %71 : vector<8x32xf32>
    %cst_27 = arith.constant 1.000000e+00 : f32
    %82 = vector.broadcast %cst_27 : f32 to vector<8x32xf32>
    %83 = arith.addf %82, %81 : vector<8x32xf32>
    %84 = arith.divf %71, %83 : vector<8x32xf32>
    %85 = arith.mulf %80, %84 : vector<8x32xf32>
    %86 = tpu.concatenate %43, %29, %85, %71 in 1 : vector<8x32xf32>, vector<8x32xf32>, vector<8x32xf32>, vector<8x32xf32> -> vector<8x128xf32>
    %c0_28 = arith.constant 0 : index
    %c0_29 = arith.constant 0 : index
    %87 = vector.load %arg12[%c0_28, %c0_29] : memref<8x128xf32, #tpu.memory_space<vmem>>, vector<8x128xf32>
    tpu.vector_store %arg12[%c0_28, %c0_29], %86 {strides = array<i32>} : memref<8x128xf32, #tpu.memory_space<vmem>>, vector<8x128xf32>,
    %c0_30 = arith.constant 0 : index
    %c0_31 = arith.constant 0 : index
    %88 = vector.load %arg9[%c0_30, %c0_31] : memref<128x2xf32, #tpu.memory_space<vmem>>, vector<128x2xf32>
    %cst_32 = arith.constant dense<0.000000e+00> : vector<8x2xf32>
    %89 = tpu.matmul %86, %88, %cst_32 {dimension_numbers = #tpu.dot_dimension_numbers<[1], [0], [0], [1], [0, 0, 1, 1], [], []>} : vector<8x128xf32>, vector<128x2xf32>, vector<8x2xf32> -> vector<8x2xf32>
    %c0_33 = arith.constant 0 : index
    %c0_34 = arith.constant 0 : index
    %90 = vector.load %arg10[%c0_33, %c0_34] : memref<1x2xf32, #tpu.memory_space<vmem>>, vector<1x2xf32>
    %91 = vector.broadcast %90 : vector<1x2xf32> to vector<8x2xf32>
    %92 = arith.addf %89, %91 : vector<8x2xf32>
    %c0_35 = arith.constant 0 : index
    %c0_36 = arith.constant 0 : index
    %93 = vector.load %arg11[%c0_35, %c0_36] : memref<8x2xf32, #tpu.memory_space<vmem>>, vector<8x2xf32>
    tpu.vector_store %arg11[%c0_35, %c0_36], %92 {strides = array<i32>} : memref<8x2xf32, #tpu.memory_space<vmem>>, vector<8x2xf32>,
    return
  }
  func.func @transform_0(%arg0: i32) -> (i32, i32) {
    %c0_i32 = arith.constant 0 : i32
    %c0_i32_0 = arith.constant 0 : i32
    return %arg0, %c0_i32 : i32, i32
  }
  func.func @transform_1(%arg0: i32) -> (i32, i32) {
    %c0_i32 = arith.constant 0 : i32
    %c0_i32_0 = arith.constant 0 : i32
    return %arg0, %c0_i32 : i32, i32
  }
  func.func @transform_2(%arg0: i32) -> (i32, i32) {
    %c0_i32 = arith.constant 0 : i32
    %c0_i32_0 = arith.constant 0 : i32
    %c0_i32_1 = arith.constant 0 : i32
    return %c0_i32, %c0_i32_0 : i32, i32
  }
  func.func @transform_3(%arg0: i32) -> (i32, i32) {
    %c0_i32 = arith.constant 0 : i32
    %c0_i32_0 = arith.constant 0 : i32
    %c0_i32_1 = arith.constant 0 : i32
    return %c0_i32, %c0_i32_0 : i32, i32
  }
  func.func @transform_4(%arg0: i32) -> (i32, i32) {
    %c0_i32 = arith.constant 0 : i32
    %c0_i32_0 = arith.constant 0 : i32
    %c0_i32_1 = arith.constant 0 : i32
    return %c0_i32, %c0_i32_0 : i32, i32
  }
  func.func @transform_5(%arg0: i32) -> (i32, i32) {
    %c0_i32 = arith.constant 0 : i32
    %c0_i32_0 = arith.constant 0 : i32
    %c0_i32_1 = arith.constant 0 : i32
    return %c0_i32, %c0_i32_0 : i32, i32
  }
  func.func @transform_6(%arg0: i32) -> (i32, i32) {
    %c0_i32 = arith.constant 0 : i32
    %c0_i32_0 = arith.constant 0 : i32
    %c0_i32_1 = arith.constant 0 : i32
    return %c0_i32, %c0_i32_0 : i32, i32
  }
  func.func @transform_7(%arg0: i32) -> (i32, i32) {
    %c0_i32 = arith.constant 0 : i32
    %c0_i32_0 = arith.constant 0 : i32
    %c0_i32_1 = arith.constant 0 : i32
    return %c0_i32, %c0_i32_0 : i32, i32
  }
  func.func @transform_8(%arg0: i32) -> (i32, i32) {
    %c0_i32 = arith.constant 0 : i32
    %c0_i32_0 = arith.constant 0 : i32
    %c0_i32_1 = arith.constant 0 : i32
    return %c0_i32, %c0_i32_0 : i32, i32
  }
  func.func @transform_9(%arg0: i32) -> (i32, i32) {
    %c0_i32 = arith.constant 0 : i32
    %c0_i32_0 = arith.constant 0 : i32
    %c0_i32_1 = arith.constant 0 : i32
    return %c0_i32, %c0_i32_0 : i32, i32
  }
  func.func @transform_10(%arg0: i32) -> (i32, i32) {
    %c0_i32 = arith.constant 0 : i32
    %c0_i32_0 = arith.constant 0 : i32
    return %arg0, %c0_i32 : i32, i32
  }
  func.func @transform_11(%arg0: i32) -> (i32, i32) {
    %c0_i32 = arith.constant 0 : i32
    %c0_i32_0 = arith.constant 0 : i32
    return %arg0, %c0_i32 : i32, i32
  }
}

</mosaic_0001>

<bundles_post_ra>
// kernel: trace_lstm_forward.1
= control target key start
LH: loop header
LB: loop body
LE: loop exit
PB: predicated region body
PF: predicated region fallthrough
CT: control target
= control target key end

     0   :  { %v868_v1 = vmov 0.0|0.0   ;;  %vm869_vm0 = vmmov 0   ;;  %v870_v4 = vmov 0.0   ;;  %s871_s23 = smov 32   ;;  %s872_s27 = smov 96   ;;  %vm43_vm1 = vcmask 261120   ;;  %s1180_s1 = inlined_call_operand.vmem [shape: f32[8,128], index: 1, kind: input, shape index: {}]   ;;  %s1181_s2 = inlined_call_operand.vmem [shape: f32[96,128], index: 2, kind: input, shape index: {}]   ;;  %s1182_s0 = inlined_call_operand.vmem [shape: f32[8,32], index: 0, kind: input, shape index: {}]   ;;  %s1183_s3 = inlined_call_operand.vmem [shape: f32[1,128], index: 3, kind: input, shape index: {}]   ;;  %s1184_s4 = inlined_call_operand.vmem [shape: f32[32,32], index: 4, kind: input, shape index: {}]   ;;  %s1185_s5 = inlined_call_operand.vmem [shape: f32[96,128], index: 5, kind: input, shape index: {}]   ;;  %s1186_s6 = inlined_call_operand.vmem [shape: f32[1,128], index: 6, kind: input, shape index: {}]   ;;  %s1187_s7 = inlined_call_operand.vmem [shape: f32[32,32], index: 7, kind: input, shape index: {}]   ;;  %s1188_s8 = inlined_call_operand.vmem [shape: f32[128,2], index: 8, kind: input, shape index: {}]   ;;  %s1189_s11 = inlined_call_operand.vmem [shape: f32[8,128], index: 11, kind: output, shape index: {1}]   ;;  %s1190_s9 = inlined_call_operand.vmem [shape: f32[1,2], index: 9, kind: input, shape index: {}]   ;;  %s1191_s10 = inlined_call_operand.vmem [shape: f32[8,2], index: 10, kind: output, shape index: {0}]  }
   0x1   :  { %v38_v0 = vld [vmem:[%s1180_s1] sm:$0xff]  ;;  %767 = vmatprep.subr.bf16.mxu1 %v868_v1  ;;  %v46_v3 = vld [vmem:[%s1181_s2 + $0x8] sm:$0xff]  ;;  %680 = vmatprep.mubr.msk.f32.mxu1 %vm869_vm0, %v870_v4  ;;  %v47_v6 = vld [vmem:[%s1181_s2 + $0x10] sm:$0xff]  ;;  %vm64_vm2 = vcmask 785408   ;;  %vm485_vm3 = vcmask 523264   ;;  %vm582_vm4 = vcmask 15360  }
   0x2   :  { %v45_v2 = vld [vmem:[%s1181_s2] sm:$0xff]  ;;  %40 = vrot.lane.b32.xlu0 %v38_v0, %s871_s23  ;;  %v48_v7 = vld [vmem:[%s1181_s2 + $0x18] sm:$0xff]  ;;  %785 = vmatprep.subr.bf16.mxu0 %v868_v1  ;;  %v50_v10 = vld [vmem:[%s1181_s2 + $0x28] sm:$0xff] }
   0x3   :  { %v768_v5 = vpack.c.bf16 %v46_v3, %v45_v2  ;;  %144 = vrot.lane.b32.xlu1 %v38_v0, %s872_s27  ;;  %691 = vmatprep.mubr.msk.f32.mxu0 %vm869_vm0, %v870_v4  ;;  %v771_v8 = vpack.c.bf16 %v48_v7, %v47_v6  ;;  %v49_v9 = vld [vmem:[%s1181_s2 + $0x20] sm:$0xff]  ;;  %v51_v12 = vld [vmem:[%s1181_s2 + $0x30] sm:$0xff]  ;;  %v52_v13 = vld [vmem:[%s1181_s2 + $0x38] sm:$0xff] }
   0x4   :  { %v774_v11 = vpack.c.bf16 %v50_v10, %v49_v9  ;;  %v777_v14 = vpack.c.bf16 %v52_v13, %v51_v12  ;;  %v53_v15 = vld [vmem:[%s1181_s2 + $0x40] sm:$0xff]  ;;  %v54_v16 = vld [vmem:[%s1181_s2 + $0x48] sm:$0xff]  ;;  %v55_v18 = vld [vmem:[%s1181_s2 + $0x50] sm:$0xff] }
   0x5   :  { %769 = vmatpush3.bf16.msra.mxu1 %v768_v5  ;;  %v780_v17 = vpack.c.bf16 %v54_v16, %v53_v15  ;;  %v56_v19 = vld [vmem:[%s1181_s2 + $0x58] sm:$0xff]  ;;  %v37_v21 = vld [vmem:[%s1182_s0] sm:$0xff]  ;;  %v163_v31 = vld [vmem:[%s1184_s4 + $0x8] sm:$0xff] }
   0x6   :  { %770 = vmatprep.subr.bf16.mxu1 %v868_v1  ;;  %v783_v20 = vpack.c.bf16 %v56_v19, %v55_v18  ;;  %v592_v24 = vld [vmem:[%s1183_s3] ss:$0 sm:$0xff]  ;;  %v164_v32 = vld [vmem:[%s1184_s4 + $0x10] sm:$0xff]  ;;  %v165_v34 = vld [vmem:[%s1184_s4 + $0x18] sm:$0xff] }
   0x7   :  { %v162_v30 = vld [vmem:[%s1184_s4] sm:$0xff]  ;;  %v789_v35 = vpack.c.bf16 %v165_v34, %v164_v32  ;;  %v265_v55 = vld [vmem:[%s1185_s5 + $0x8] sm:$0xff]  ;;  %v266_v56 = vld [vmem:[%s1185_s5 + $0x10] sm:$0xff] }
   0x8   :  { %v786_v33 = vpack.c.bf16 %v163_v31, %v162_v30  ;;  %v264_v54 = vld [vmem:[%s1185_s5] sm:$0xff]  ;;  %v267_v58 = vld [vmem:[%s1185_s5 + $0x18] sm:$0xff]  ;;  %v269_v61 = vld [vmem:[%s1185_s5 + $0x28] sm:$0xff] }
   0x9   :  { %772 = vmatpush3.bf16.msra.mxu1 %v771_v8  ;;  %v792_v57 = vpack.c.bf16 %v265_v55, %v264_v54  ;;  %v795_v59 = vpack.c.bf16 %v267_v58, %v266_v56  ;;  %v268_v60 = vld [vmem:[%s1185_s5 + $0x20] sm:$0xff]  ;;  %v270_v63 = vld [vmem:[%s1185_s5 + $0x30] sm:$0xff]  ;;  %v271_v0 = vld [vmem:[%s1185_s5 + $0x38] sm:$0xff] }
   0xa   :  { %773 = vmatprep.subr.bf16.mxu1 %v868_v1  ;;  %787 = vmatpush3.bf16.msra.mxu0 %v786_v33  ;;  %v798_v62 = vpack.c.bf16 %v269_v61, %v268_v60  ;;  %v801_v2 = vpack.c.bf16 %v271_v0, %v270_v63  ;;  %v272_v3 = vld [vmem:[%s1185_s5 + $0x40] sm:$0xff]  ;;  %v273_v5 = vld [vmem:[%s1185_s5 + $0x48] sm:$0xff]  ;;  %v274_v7 = vld [vmem:[%s1185_s5 + $0x50] sm:$0xff] }
   0xb   :  { %788 = vmatprep.subr.bf16.mxu0 %v868_v1  ;;  %v804_v6 = vpack.c.bf16 %v273_v5, %v272_v3  ;;  %v275_v8 = vld [vmem:[%s1185_s5 + $0x58] sm:$0xff]  ;;  %v493_v54 = vld [vmem:[%s1188_s8 + $0x20] sm:$0xff]  ;;  %v494_v55 = vld [vmem:[%s1188_s8 + $0x28] sm:$0xff] }
   0xc   :  { %v807_v9 = vpack.c.bf16 %v275_v8, %v274_v7  ;;  %v380_v31 = vld [vmem:[%s1187_s7 + $0x18] sm:$0xff]  ;;  %v822_v56 = vpack.c.bf16 %v494_v55, %v493_v54  ;;  %v497_v60 = vld [vmem:[%s1188_s8 + $0x40] sm:$0xff]  ;;  %v498_v61 = vld [vmem:[%s1188_s8 + $0x48] sm:$0xff] }
   0xd   :  { %775 = vmatpush3.bf16.msra.mxu1 %v774_v11  ;;  %v496_v58 = vld [vmem:[%s1188_s8 + $0x38] sm:$0xff]  ;;  %v499_v63 = vld [vmem:[%s1188_s8 + $0x50] sm:$0xff]  ;;  %v501_v3 = vld [vmem:[%s1188_s8 + $0x60] sm:$0xff] }
   0xe   :  { %776 = vmatprep.subr.bf16.mxu1 %v868_v1  ;;  %790 = vmatpush3.bf16.msra.mxu0 %v789_v35  ;;  %v500_v0 = vld [vmem:[%s1188_s8 + $0x58] sm:$0xff]  ;;  %v502_v5 = vld [vmem:[%s1188_s8 + $0x68] sm:$0xff]  ;;  %v503_v7 = vld [vmem:[%s1188_s8 + $0x70] sm:$0xff] }
   0xf   :  { %809 = vmatprep.subr.bf16.mxu0 %v868_v1  ;;  %v504_v8 = vld [vmem:[%s1188_s8 + $0x78] sm:$0xff] }
  0x11   :  { %778 = vmatpush3.bf16.msra.mxu1 %v777_v14 }
  0x12   :  { %779 = vmatprep.subr.bf16.mxu1 %v868_v1 }
  0x15   :  { %781 = vmatpush3.bf16.msra.mxu1 %v780_v17 }
  0x16   :  { %782 = vmatprep.subr.bf16.mxu1 %v868_v1 }
  0x19   :  { %784 = vmatpush3.bf16.msra.mxu1 %v783_v20  ;;  %v597_v20 = vld [vmem:[%s1186_s6] ss:$0 sm:$0xff] }
  0x1a   :  { %791 = vmatprep.subr.bf16.mxu1 %v868_v1 }
  0x74   :  { %v989_v22 = vpop.permute.xlu0 %40 }
  0x75   :  { %v44_v23 = vsel %vm43_vm1, %v37_v21, %v989_v22  ;;  %v145_v44 = vpop.permute.xlu1 %144 }
  0x76   :  { %681 = vmatmul.mubr.msk.f32.vlgmr.msra.gmra.mrb[0].mxu1 %vm64_vm2, %v44_v23 }
  0x77   :  { %718 = vmatprep.mubr.msk.f32.mxu1 %vm869_vm0, %v870_v4  ;;  %793 = vmatpush3.bf16.msra.mxu1 %v792_v57  ;;  %v495_v57 = vld [vmem:[%s1188_s8 + $0x30] sm:$0xff] }
  0x78   :  { %794 = vmatprep.subr.bf16.mxu1 %v868_v1 }
  0x7b   :  { %796 = vmatpush3.bf16.msra.mxu1 %v795_v59  ;;  %v825_v59 = vpack.c.bf16 %v496_v58, %v495_v57 }
  0x7c   :  { %797 = vmatprep.subr.bf16.mxu1 %v868_v1 }
  0x7f   :  { %799 = vmatpush3.bf16.msra.mxu1 %v798_v62  ;;  %v828_v62 = vpack.c.bf16 %v498_v61, %v497_v60 }
  0x80   :  { %800 = vmatprep.subr.bf16.mxu1 %v868_v1 }
  0x83   :  { %802 = vmatpush3.bf16.msra.mxu1 %v801_v2  ;;  %v831_v2 = vpack.c.bf16 %v500_v0, %v499_v63 }
  0x84   :  { %803 = vmatprep.subr.bf16.mxu1 %v868_v1 }
  0x87   :  { %805 = vmatpush3.bf16.msra.mxu1 %v804_v6  ;;  %v834_v6 = vpack.c.bf16 %v502_v5, %v501_v3 }
  0x88   :  { %806 = vmatprep.subr.bf16.mxu1 %v868_v1 }
  0x8b   :  { %808 = vmatpush3.bf16.msra.mxu1 %v807_v9  ;;  %v837_v9 = vpack.c.bf16 %v504_v8, %v503_v7 }
 0x149   :  { %v134_v25 = vpop.f32.mrb[0].mxu1 }
 0x14a   :  { %v999_v26 = vadd.f32 %v592_v24, %v134_v25  ;;  %v682_v27 = vpop.f32.mrb[1].mxu1 }
 0x14b   :  { %v377_v27 = vld [vmem:[%s1187_s7] sm:$0xff] }
 0x14c   :  { %v148_v28 = vand.u32 2147483647, %v999_v26  ;;  %v594_v38 = vmul.f32 -1.442695, %v999_v26 }
 0x14e   :  { %v149_v29 = vadd.f32 1.0, %v148_v28  ;;  %v378_v28 = vld [vmem:[%s1187_s7 + $0x8] sm:$0xff] }
 0x14f   :  { %v810_v30 = vpack.c.bf16 %v378_v28, %v377_v27 }
 0x150   :  { %844 = vrcp.f32 %v149_v29  ;;  %v379_v29 = vld [vmem:[%s1187_s7 + $0x10] sm:$0xff] }
 0x151   :  { %846 = vpow2.f32 %v594_v38  ;;  %v813_v32 = vpack.c.bf16 %v380_v31, %v379_v29 }
 0x15a   :  { %v845_v36 = vpop.eup %844 }
 0x15b   :  { %v151_v37 = vmul.f32 %v845_v36, %v999_v26  ;;  %v847_v39 = vpop.eup %846 }
 0x15c   :  { %v141_v40 = vadd.f32 1.0, %v847_v39 }
 0x15d   :  { %153 = vrot.lane.b32.xlu0 %v151_v37, %s872_s27 }
 0x15e   :  { %848 = vrcp.f32 %v141_v40 }
 0x168   :  { %v849_v41 = vpop.eup %848 }
 0x169   :  { %v147_v45 = vmul.f32 %v849_v41, %v145_v44 }
 0x1cf   :  { %v154_v42 = vpop.permute.xlu0 %153 }
 0x1d0   :  { %v156_v43 = vmul.f32 %v849_v41, %v154_v42 }
 0x1d2   :  { %158 = vrot.lane.b32.xlu1 %v156_v43, %s872_s27 }
 0x244   :  { %v159_v46 = vpop.permute.xlu1 %158 }
 0x245   :  { %v1020_v47 = vadd.f32 %v159_v46, %v147_v45 }
 0x247   :  { %v250_v48 = vand.u32 2147483647, %v1020_v47  ;;  %692 = vmatmul.mubr.msk.f32.vlgmr.msra.gmra.mrb[0].mxu0 %vm43_vm1, %v1020_v47 }
 0x248   :  { %729 = vmatprep.mubr.msk.f32.mxu0 %vm869_vm0, %v870_v4  ;;  %811 = vmatpush3.bf16.msra.mxu0 %v810_v30 }
 0x249   :  { %v251_v49 = vadd.f32 1.0, %v250_v48  ;;  %812 = vmatprep.subr.bf16.mxu0 %v868_v1 }
 0x24b   :  { %850 = vrcp.f32 %v251_v49 }
 0x24c   :  { %814 = vmatpush3.bf16.msra.mxu0 %v813_v32 }
 0x24d   :  { %815 = vmatprep.subr.bf16.mxu0 %v868_v1 }
 0x255   :  { %v851_v50 = vpop.eup %850 }
 0x256   :  { %v253_v51 = vmul.f32 %v851_v50, %v1020_v47 }
 0x258   :  { %255 = vrot.lane.b32.xlu1 %v253_v51, %s872_s27  ;;  %v491_v51 = vld [vmem:[%s1188_s8 + $0x10] sm:$0xff] }
 0x2ca   :  { %v256_v16 = vpop.permute.xlu1 %255 }
 0x31a   :  { %v235_v52 = vpop.f32.mrb[0].mxu0 }
 0x31b   :  { %240 = vrot.lane.b32.xlu0 %v235_v52, %s872_s27  ;;  %v693_v53 = vpop.f32.mrb[1].mxu0 }
 0x31c   :  { %v492_v53 = vld [vmem:[%s1188_s8 + $0x18] sm:$0xff] }
 0x38d   :  { %v241_v10 = vpop.permute.xlu0 %240 }
 0x38e   :  { %v243_v11 = vadd.f32 %v241_v10, %v999_v26 }
 0x390   :  { %v596_v12 = vmul.f32 -1.442695, %v243_v11 }
 0x392   :  { %852 = vpow2.f32 %v596_v12 }
 0x39c   :  { %v853_v13 = vpop.eup %852 }
 0x39d   :  { %v247_v14 = vadd.f32 1.0, %v853_v13 }
 0x39f   :  { %854 = vrcp.f32 %v247_v14 }
 0x3a9   :  { %v855_v15 = vpop.eup %854 }
 0x3aa   :  { %v258_v17 = vmul.f32 %v855_v15, %v256_v16 }
 0x3ac   :  { %260 = vrot.lane.b32.xlu0 %v258_v17, %s871_s23 }
 0x41e   :  { %v1073_v18 = vpop.permute.xlu0 %260 }
 0x41f   :  { %v263_v19 = vsel %vm43_vm1, %v1073_v18, %v145_v44 }
 0x420   :  { %719 = vmatmul.mubr.msk.f32.vlgmr.msra.gmra.mrb[2].mxu1 %vm64_vm2, %v263_v19 }
 0x4f3   :  { %v352_v21 = vpop.f32.mrb[2].mxu1 }
 0x4f4   :  { %v1081_v23 = vadd.f32 %v597_v20, %v352_v21  ;;  %v720_v24 = vpop.f32.mrb[3].mxu1 }
 0x4f6   :  { %v363_v25 = vand.u32 2147483647, %v1081_v23  ;;  %v599_v35 = vmul.f32 -1.442695, %v1081_v23 }
 0x4f8   :  { %v364_v26 = vadd.f32 1.0, %v363_v25  ;;  %v602_v25 = vld [vmem:[%s1190_s9] ss:$0 sm:$0xff] }
 0x4fa   :  { %856 = vrcp.f32 %v364_v26 }
 0x4fb   :  { %858 = vpow2.f32 %v599_v35 }
 0x504   :  { %v857_v33 = vpop.eup %856 }
 0x505   :  { %v366_v34 = vmul.f32 %v857_v33, %v1081_v23  ;;  %v859_v36 = vpop.eup %858 }
 0x506   :  { %v359_v37 = vadd.f32 1.0, %v859_v36 }
 0x507   :  { %368 = vrot.lane.b32.xlu1 %v366_v34, %s872_s27 }
 0x508   :  { %860 = vrcp.f32 %v359_v37 }
 0x512   :  { %v861_v38 = vpop.eup %860 }
 0x513   :  { %v362_v41 = vmul.f32 %v861_v38, %v989_v22  ;;  %v489_v22 = vld [vmem:[%s1188_s8] sm:$0xff] }
 0x579   :  { %v369_v39 = vpop.permute.xlu1 %368 }
 0x57a   :  { %v371_v40 = vmul.f32 %v861_v38, %v369_v39 }
 0x57c   :  { %373 = vrot.lane.b32.xlu0 %v371_v40, %s872_s27 }
 0x5ee   :  { %v374_v42 = vpop.permute.xlu0 %373 }
 0x5ef   :  { %v376_v43 = vadd.f32 %v374_v42, %v362_v41 }
 0x5f1   :  { %v465_v44 = vand.u32 2147483647, %v376_v43  ;;  %730 = vmatmul.mubr.msk.f32.vlgmr.msra.gmra.mrb[2].mxu0 %vm43_vm1, %v376_v43 }
 0x5f2   :  { %764 = vmatprep.mubr.msk.f32.mxu0 %vm869_vm0, %v870_v4  ;;  %v490_v4 = vld [vmem:[%s1188_s8 + $0x8] sm:$0xff] }
 0x5f3   :  { %v466_v45 = vadd.f32 1.0, %v465_v44  ;;  %v816_v52 = vpack.c.bf16 %v490_v4, %v489_v22 }
 0x5f5   :  { %862 = vrcp.f32 %v466_v45  ;;  %817 = vmatpush3.bf16.msra.mxu0 %v816_v52 }
 0x5f6   :  { %818 = vmatprep.subr.bf16.mxu0 %v868_v1 }
 0x5ff   :  { %v863_v46 = vpop.eup %862 }
 0x600   :  { %v468_v48 = vmul.f32 %v863_v46, %v376_v43 }
 0x602   :  { %470 = vrot.lane.b32.xlu0 %v468_v48, %s872_s27 }
 0x674   :  { %v471_v16 = vpop.permute.xlu0 %470 }
 0x6c4   :  { %v450_v49 = vpop.f32.mrb[2].mxu0 }
 0x6c5   :  { %455 = vrot.lane.b32.xlu1 %v450_v49, %s872_s27  ;;  %v731_v50 = vpop.f32.mrb[3].mxu0 }
 0x6c9   :  { %474 = vrot.lane.b32.xlu1 %v1020_v47, %s871_s23  ;;  %v819_v47 = vpack.c.bf16 %v492_v53, %v491_v51 }
 0x6cb   :  { %820 = vmatpush3.bf16.msra.mxu0 %v819_v47 }
 0x6cc   :  { %821 = vmatprep.subr.bf16.mxu0 %v868_v1 }
 0x6cd   :  { %481 = vrot.lane.b32.xlu1 %v376_v43, %s872_s27 }
 0x6cf   :  { %823 = vmatpush3.bf16.msra.mxu0 %v822_v56 }
 0x6d0   :  { %824 = vmatprep.subr.bf16.mxu0 %v868_v1 }
 0x6d3   :  { %826 = vmatpush3.bf16.msra.mxu0 %v825_v59 }
 0x6d4   :  { %827 = vmatprep.subr.bf16.mxu0 %v868_v1 }
 0x6d7   :  { %829 = vmatpush3.bf16.msra.mxu0 %v828_v62 }
 0x6d8   :  { %830 = vmatprep.subr.bf16.mxu0 %v868_v1 }
 0x6db   :  { %832 = vmatpush3.bf16.msra.mxu0 %v831_v2 }
 0x6dc   :  { %833 = vmatprep.subr.bf16.mxu0 %v868_v1 }
 0x6df   :  { %835 = vmatpush3.bf16.msra.mxu0 %v834_v6 }
 0x6e0   :  { %836 = vmatprep.subr.bf16.mxu0 %v868_v1 }
 0x6e3   :  { %838 = vmatpush3.bf16.msra.mxu0 %v837_v9 }
 0x737   :  { %v456_v10 = vpop.permute.xlu1 %455 }
 0x738   :  { %v458_v11 = vadd.f32 %v456_v10, %v1081_v23 }
 0x73a   :  { %v601_v12 = vmul.f32 -1.442695, %v458_v11 }
 0x73b   :  { %v475_v19 = vpop.permute.xlu1 %474 }
 0x73c   :  { %864 = vpow2.f32 %v601_v12  ;;  %v484_v20 = vsel %vm43_vm1, %v1073_v18, %v475_v19 }
 0x73f   :  { %v482_v21 = vpop.permute.xlu1 %481 }
 0x746   :  { %v865_v13 = vpop.eup %864 }
 0x747   :  { %v462_v14 = vadd.f32 1.0, %v865_v13 }
 0x749   :  { %866 = vrcp.f32 %v462_v14 }
 0x753   :  { %v867_v15 = vpop.eup %866 }
 0x754   :  { %v473_v17 = vmul.f32 %v867_v15, %v471_v16 }
 0x756   :  { %478 = vrot.lane.b32.xlu0 %v473_v17, %s872_s27 }
 0x7c8   :  { %v479_v1 = vpop.permute.xlu0 %478 }
 0x7c9   :  { %v486_v24 = vsel %vm485_vm3, %v484_v20, %v479_v1 }
 0x7ca   :  { %v487_v23 = vsel %vm64_vm2, %v486_v24, %v482_v21 }
 0x7cb   :  { %488 = vst [vmem:[%s1189_s11] sm:$0xff] %v487_v23  ;;  %765 = vmatmul.mubr.f32.vlgmr.msra.gmra.mrb[4].mxu0 %v487_v23 }
 0x89e   :  { %v578_v26 = vpop.f32.mrb[4].mxu0 }
 0x89f   :  { %v579_v27 = vadd.f32 %v602_v25, %v578_v26  ;;  %v766_v28 = vpop.f32.mrb[5].mxu0 }
 0x8a1   :  { %583 = vst.msk [vmem:[%s1191_s10] sm:$0xff] %vm582_vm4, %v579_v27 }

</bundles_post_ra>
